<compile_context>
chip_gen: v7x
topology: tpu7x:2x2x1
jax: 0.10.0
libtpu: 0.0.40
codegen_flags: <defaults>
</compile_context>

<pallas_src>
import jax
import jax.numpy as jnp
from jax.experimental import pallas as pl
from jax.experimental.pallas import tpu as pltpu

H = 3  # hidden width fixed by the module definition


def _sigmoid(z):
    # One EUP push (tanh) instead of exp + divide.
    return 0.5 * jnp.tanh(0.5 * z) + 0.5


def ann_kernel(xt_ref, w1_ref, p_ref, o_ref):
    # xt_ref: (in_dim, TB)  f32, batch tile on the 128-lane axis
    # w1_ref: (H, in_dim)   f32, layer-1 weight (PyTorch (fan_out, fan_in) layout)
    # p_ref : SMEM f32[H + H*H + H + out_dim*H + out_dim]
    #         = [ b1(H) | W2 row-major (HxH) | b2(H) | W3 row-major (out_dim x H) | b3(out_dim) ]
    # o_ref : (out_dim, TB) f32
    out_dim = o_ref.shape[0]

    off_b1 = 0
    off_w2 = off_b1 + H
    off_b2 = off_w2 + H * H
    off_w3 = off_b2 + H
    off_b3 = off_w3 + out_dim * H

    xt = xt_ref[...]

    # ---- Layer 1: z1 = W1 @ x^T  -> (H, TB) on the MXU (general in_dim).
    z1 = jnp.dot(w1_ref[...], xt, preferred_element_type=jnp.float32)

    # bias + sigmoid per hidden row, each row is a lane-dense (1, TB) vector
    h1 = [_sigmoid(z1[j:j + 1, :] + p_ref[off_b1 + j]) for j in range(H)]

    # ---- Layer 2: K=3 contraction as broadcast FMAs on the VPU (no MXU round-trip).
    h2 = []
    for j in range(H):
        z = p_ref[off_b2 + j] + p_ref[off_w2 + j * H] * h1[0]
        for k in range(1, H):
            z = z + p_ref[off_w2 + j * H + k] * h1[k]
        h2.append(_sigmoid(z))

    # ---- Layer 3: K=3 contraction as broadcast FMAs; single lane-dense output store.
    rows = []
    for j in range(out_dim):
        z = p_ref[off_b3 + j] + p_ref[off_w3 + j * H] * h2[0]
        for k in range(1, H):
            z = z + p_ref[off_w3 + j * H + k] * h2[k]
        rows.append(_sigmoid(z))

    o_ref[...] = jnp.concatenate(rows, axis=0).astype(o_ref.dtype)


def _round_up(v, m):
    return ((v + m - 1) // m) * m


def ann_forward(x, w1, b1, w2, b2, w3, b3, *, batch_tile=None):
    """Fused 3-layer MLP (Linear->Sigmoid x3) as a single batch-tiled Pallas TPU kernel.

    x : (batch, in_dim) float32
    w1: (3, in_dim)    b1: (3,)       (PyTorch nn.Linear layout: (fan_out, fan_in))
    w2: (3, 3)         b2: (3,)
    w3: (out_dim, 3)   b3: (out_dim,)
    returns: (batch, out_dim) float32
    """
    batch, in_dim = x.shape
    out_dim = w3.shape[0]

    if batch_tile is None:
        # Multiple of 128 lanes; large enough to approach the HBM roofline, small
        # enough (with double buffering) to fit v7x's smaller VMEM comfortably.
        batch_tile = min(1024, _round_up(batch, 128))
    padded = _round_up(batch, batch_tile)
    n_tiles = padded // batch_tile

    # Feature-major layout: batch on the lane axis, zero-padded to the tile size.
    xt = jnp.zeros((in_dim, padded), jnp.float32).at[:, :batch].set(x.T.astype(jnp.float32))

    # All biases + the tiny layer-2/3 weights consolidated into one flat SMEM array.
    p = jnp.concatenate([
        b1.reshape(-1), w2.reshape(-1), b2.reshape(-1),
        w3.reshape(-1), b3.reshape(-1),
    ]).astype(jnp.float32)

    ot = pl.pallas_call(
        ann_kernel,
        out_shape=jax.ShapeDtypeStruct((out_dim, padded), jnp.float32),
        grid=(n_tiles,),
        in_specs=[
            pl.BlockSpec((in_dim, batch_tile), lambda i: (0, i)),   # x^T batch tile (pipelined)
            pl.BlockSpec((H, in_dim), lambda i: (0, 0)),            # W1 resident across grid
            pl.BlockSpec(memory_space=pltpu.MemorySpace.SMEM),      # biases + W2/W3 scalars
        ],
        out_specs=pl.BlockSpec((out_dim, batch_tile), lambda i: (0, i)),
        compiler_params=pltpu.CompilerParams(
            dimension_semantics=("parallel",),                      # shard batch grid across TCs (v7x)
        ),
    )(xt, w1.astype(jnp.float32), p)

    # Back to PyTorch's (batch, out_dim) layout; drop the padding columns.
    return ot[:, :batch].T


def init_params(key, in_dim, out_dim):
    """Deterministic PyTorch-Linear-style init, weights in (fan_out, fan_in) layout."""
    ks = jax.random.split(key, 6)

    def linear_init(kw, kb, fan_in, fan_out):
        bound = 1.0 / jnp.sqrt(jnp.float32(fan_in))
        w = jax.random.uniform(kw, (fan_out, fan_in), jnp.float32, -bound, bound)
        b = jax.random.uniform(kb, (fan_out,), jnp.float32, -bound, bound)
        return w, b

    w1, b1 = linear_init(ks[0], ks[1], in_dim, H)
    w2, b2 = linear_init(ks[2], ks[3], H, H)
    w3, b3 = linear_init(ks[4], ks[5], H, out_dim)
    return w1, b1, w2, b2, w3, b3


if __name__ == "__main__":
    key = jax.random.PRNGKey(0)
    k_x, k_p = jax.random.split(key)

    batch, in_dim, out_dim = 64, 16, 4
    x = jax.random.normal(k_x, (batch, in_dim), dtype=jnp.float32)
    params = init_params(k_p, in_dim, out_dim)

    out = ann_forward(x, *params)
    out = jax.block_until_ready(out)

    # Reference in plain JAX (PyTorch semantics: y = x @ W.T + b, exp-based sigmoid).
    w1, b1, w2, b2, w3, b3 = params
    ref = jax.nn.sigmoid(
        jax.nn.sigmoid(jax.nn.sigmoid(x @ w1.T + b1) @ w2.T + b2) @ w3.T + b3
    )

    assert out.shape == (batch, out_dim)
    # Slightly loose tol: kernel uses the hardware tanh form of sigmoid.
    assert jnp.allclose(out, ref, atol=1e-4, rtol=1e-4), "mismatch vs reference"

    print("KERNEL_OK")
</pallas_src>

<mosaic_0001>
module attributes {stable_mosaic.version = 11 : i64} {
  func.func @ann_kernel(%arg0: i32, %arg1: memref<16x128xf32, #tpu.memory_space<vmem>>, %arg2: memref<3x16xf32, #tpu.memory_space<vmem>>, %arg3: memref<31xf32, #tpu.memory_space<smem>>, %arg4: memref<4x128xf32, #tpu.memory_space<vmem>>) attributes {dimension_semantics = [#tpu.dimension_semantics<parallel>], iteration_bounds = array<i64: 1>, scalar_prefetch = 0 : i64, scratch_operands = 0 : i64, tpu.core_type = #tpu.core_type<tc>, window_params = [{transform_indices = @transform_0, window_bounds = array<i64: 16, 128>}, {pipeline_mode = #tpu.pipeline_mode<synchronous>, transform_indices = @transform_1, window_bounds = array<i64: 3, 16>}, {transform_indices = @transform_2, window_bounds = array<i64: 31>}, {transform_indices = @transform_3, window_bounds = array<i64: 4, 128>}]} {
    %c0 = arith.constant 0 : index
    %c0_0 = arith.constant 0 : index
    %0 = vector.load %arg1[%c0, %c0_0] : memref<16x128xf32, #tpu.memory_space<vmem>>, vector<16x128xf32>
    %c0_1 = arith.constant 0 : index
    %c0_2 = arith.constant 0 : index
    %1 = vector.load %arg2[%c0_1, %c0_2] : memref<3x16xf32, #tpu.memory_space<vmem>>, vector<3x16xf32>
    %cst = arith.constant dense<0.000000e+00> : vector<3x128xf32>
    %2 = tpu.matmul %1, %0, %cst {dimension_numbers = #tpu.dot_dimension_numbers<[1], [0], [0], [1], [0, 0, 1, 1], [], []>} : vector<3x16xf32>, vector<16x128xf32>, vector<3x128xf32> -> vector<3x128xf32>
    %3 = vector.extract_strided_slice %2 {offsets = [0, 0], sizes = [1, 128], strides = [1, 1]} : vector<3x128xf32> to vector<1x128xf32>
    %c0_3 = arith.constant 0 : index
    %4 = memref.load %arg3[%c0_3] : memref<31xf32, #tpu.memory_space<smem>>
    %5 = vector.broadcast %4 : f32 to vector<1x128xf32>
    %6 = arith.addf %3, %5 : vector<1x128xf32>
    %cst_4 = arith.constant 5.000000e-01 : f32
    %7 = vector.broadcast %cst_4 : f32 to vector<1x128xf32>
    %8 = arith.mulf %7, %6 : vector<1x128xf32>
    %9 = math.tanh %8 : vector<1x128xf32>
    %cst_5 = arith.constant 5.000000e-01 : f32
    %10 = vector.broadcast %cst_5 : f32 to vector<1x128xf32>
    %11 = arith.mulf %10, %9 : vector<1x128xf32>
    %cst_6 = arith.constant 5.000000e-01 : f32
    %12 = vector.broadcast %cst_6 : f32 to vector<1x128xf32>
    %13 = arith.addf %11, %12 : vector<1x128xf32>
    %14 = vector.extract_strided_slice %2 {offsets = [1, 0], sizes = [1, 128], strides = [1, 1]} : vector<3x128xf32> to vector<1x128xf32>
    %c1 = arith.constant 1 : index
    %15 = memref.load %arg3[%c1] : memref<31xf32, #tpu.memory_space<smem>>
    %16 = vector.broadcast %15 : f32 to vector<1x128xf32>
    %17 = arith.addf %14, %16 : vector<1x128xf32>
    %cst_7 = arith.constant 5.000000e-01 : f32
    %18 = vector.broadcast %cst_7 : f32 to vector<1x128xf32>
    %19 = arith.mulf %18, %17 : vector<1x128xf32>
    %20 = math.tanh %19 : vector<1x128xf32>
    %cst_8 = arith.constant 5.000000e-01 : f32
    %21 = vector.broadcast %cst_8 : f32 to vector<1x128xf32>
    %22 = arith.mulf %21, %20 : vector<1x128xf32>
    %cst_9 = arith.constant 5.000000e-01 : f32
    %23 = vector.broadcast %cst_9 : f32 to vector<1x128xf32>
    %24 = arith.addf %22, %23 : vector<1x128xf32>
    %25 = vector.extract_strided_slice %2 {offsets = [2, 0], sizes = [1, 128], strides = [1, 1]} : vector<3x128xf32> to vector<1x128xf32>
    %c2 = arith.constant 2 : index
    %26 = memref.load %arg3[%c2] : memref<31xf32, #tpu.memory_space<smem>>
    %27 = vector.broadcast %26 : f32 to vector<1x128xf32>
    %28 = arith.addf %25, %27 : vector<1x128xf32>
    %cst_10 = arith.constant 5.000000e-01 : f32
    %29 = vector.broadcast %cst_10 : f32 to vector<1x128xf32>
    %30 = arith.mulf %29, %28 : vector<1x128xf32>
    %31 = math.tanh %30 : vector<1x128xf32>
    %cst_11 = arith.constant 5.000000e-01 : f32
    %32 = vector.broadcast %cst_11 : f32 to vector<1x128xf32>
    %33 = arith.mulf %32, %31 : vector<1x128xf32>
    %cst_12 = arith.constant 5.000000e-01 : f32
    %34 = vector.broadcast %cst_12 : f32 to vector<1x128xf32>
    %35 = arith.addf %33, %34 : vector<1x128xf32>
    %c12 = arith.constant 12 : index
    %36 = memref.load %arg3[%c12] : memref<31xf32, #tpu.memory_space<smem>>
    %c3 = arith.constant 3 : index
    %37 = memref.load %arg3[%c3] : memref<31xf32, #tpu.memory_space<smem>>
    %38 = vector.broadcast %37 : f32 to vector<1x128xf32>
    %39 = arith.mulf %38, %13 : vector<1x128xf32>
    %40 = vector.broadcast %36 : f32 to vector<1x128xf32>
    %41 = arith.addf %40, %39 : vector<1x128xf32>
    %c4 = arith.constant 4 : index
    %42 = memref.load %arg3[%c4] : memref<31xf32, #tpu.memory_space<smem>>
    %43 = vector.broadcast %42 : f32 to vector<1x128xf32>
    %44 = arith.mulf %43, %24 : vector<1x128xf32>
    %45 = arith.addf %41, %44 : vector<1x128xf32>
    %c5 = arith.constant 5 : index
    %46 = memref.load %arg3[%c5] : memref<31xf32, #tpu.memory_space<smem>>
    %47 = vector.broadcast %46 : f32 to vector<1x128xf32>
    %48 = arith.mulf %47, %35 : vector<1x128xf32>
    %49 = arith.addf %45, %48 : vector<1x128xf32>
    %cst_13 = arith.constant 5.000000e-01 : f32
    %50 = vector.broadcast %cst_13 : f32 to vector<1x128xf32>
    %51 = arith.mulf %50, %49 : vector<1x128xf32>
    %52 = math.tanh %51 : vector<1x128xf32>
    %cst_14 = arith.constant 5.000000e-01 : f32
    %53 = vector.broadcast %cst_14 : f32 to vector<1x128xf32>
    %54 = arith.mulf %53, %52 : vector<1x128xf32>
    %cst_15 = arith.constant 5.000000e-01 : f32
    %55 = vector.broadcast %cst_15 : f32 to vector<1x128xf32>
    %56 = arith.addf %54, %55 : vector<1x128xf32>
    %c13 = arith.constant 13 : index
    %57 = memref.load %arg3[%c13] : memref<31xf32, #tpu.memory_space<smem>>
    %c6 = arith.constant 6 : index
    %58 = memref.load %arg3[%c6] : memref<31xf32, #tpu.memory_space<smem>>
    %59 = vector.broadcast %58 : f32 to vector<1x128xf32>
    %60 = arith.mulf %59, %13 : vector<1x128xf32>
    %61 = vector.broadcast %57 : f32 to vector<1x128xf32>
    %62 = arith.addf %61, %60 : vector<1x128xf32>
    %c7 = arith.constant 7 : index
    %63 = memref.load %arg3[%c7] : memref<31xf32, #tpu.memory_space<smem>>
    %64 = vector.broadcast %63 : f32 to vector<1x128xf32>
    %65 = arith.mulf %64, %24 : vector<1x128xf32>
    %66 = arith.addf %62, %65 : vector<1x128xf32>
    %c8 = arith.constant 8 : index
    %67 = memref.load %arg3[%c8] : memref<31xf32, #tpu.memory_space<smem>>
    %68 = vector.broadcast %67 : f32 to vector<1x128xf32>
    %69 = arith.mulf %68, %35 : vector<1x128xf32>
    %70 = arith.addf %66, %69 : vector<1x128xf32>
    %cst_16 = arith.constant 5.000000e-01 : f32
    %71 = vector.broadcast %cst_16 : f32 to vector<1x128xf32>
    %72 = arith.mulf %71, %70 : vector<1x128xf32>
    %73 = math.tanh %72 : vector<1x128xf32>
    %cst_17 = arith.constant 5.000000e-01 : f32
    %74 = vector.broadcast %cst_17 : f32 to vector<1x128xf32>
    %75 = arith.mulf %74, %73 : vector<1x128xf32>
    %cst_18 = arith.constant 5.000000e-01 : f32
    %76 = vector.broadcast %cst_18 : f32 to vector<1x128xf32>
    %77 = arith.addf %75, %76 : vector<1x128xf32>
    %c14 = arith.constant 14 : index
    %78 = memref.load %arg3[%c14] : memref<31xf32, #tpu.memory_space<smem>>
    %c9 = arith.constant 9 : index
    %79 = memref.load %arg3[%c9] : memref<31xf32, #tpu.memory_space<smem>>
    %80 = vector.broadcast %79 : f32 to vector<1x128xf32>
    %81 = arith.mulf %80, %13 : vector<1x128xf32>
    %82 = vector.broadcast %78 : f32 to vector<1x128xf32>
    %83 = arith.addf %82, %81 : vector<1x128xf32>
    %c10 = arith.constant 10 : index
    %84 = memref.load %arg3[%c10] : memref<31xf32, #tpu.memory_space<smem>>
    %85 = vector.broadcast %84 : f32 to vector<1x128xf32>
    %86 = arith.mulf %85, %24 : vector<1x128xf32>
    %87 = arith.addf %83, %86 : vector<1x128xf32>
    %c11 = arith.constant 11 : index
    %88 = memref.load %arg3[%c11] : memref<31xf32, #tpu.memory_space<smem>>
    %89 = vector.broadcast %88 : f32 to vector<1x128xf32>
    %90 = arith.mulf %89, %35 : vector<1x128xf32>
    %91 = arith.addf %87, %90 : vector<1x128xf32>
    %cst_19 = arith.constant 5.000000e-01 : f32
    %92 = vector.broadcast %cst_19 : f32 to vector<1x128xf32>
    %93 = arith.mulf %92, %91 : vector<1x128xf32>
    %94 = math.tanh %93 : vector<1x128xf32>
    %cst_20 = arith.constant 5.000000e-01 : f32
    %95 = vector.broadcast %cst_20 : f32 to vector<1x128xf32>
    %96 = arith.mulf %95, %94 : vector<1x128xf32>
    %cst_21 = arith.constant 5.000000e-01 : f32
    %97 = vector.broadcast %cst_21 : f32 to vector<1x128xf32>
    %98 = arith.addf %96, %97 : vector<1x128xf32>
    %c27 = arith.constant 27 : index
    %99 = memref.load %arg3[%c27] : memref<31xf32, #tpu.memory_space<smem>>
    %c15 = arith.constant 15 : index
    %100 = memref.load %arg3[%c15] : memref<31xf32, #tpu.memory_space<smem>>
    %101 = vector.broadcast %100 : f32 to vector<1x128xf32>
    %102 = arith.mulf %101, %56 : vector<1x128xf32>
    %103 = vector.broadcast %99 : f32 to vector<1x128xf32>
    %104 = arith.addf %103, %102 : vector<1x128xf32>
    %c16 = arith.constant 16 : index
    %105 = memref.load %arg3[%c16] : memref<31xf32, #tpu.memory_space<smem>>
    %106 = vector.broadcast %105 : f32 to vector<1x128xf32>
    %107 = arith.mulf %106, %77 : vector<1x128xf32>
    %108 = arith.addf %104, %107 : vector<1x128xf32>
    %c17 = arith.constant 17 : index
    %109 = memref.load %arg3[%c17] : memref<31xf32, #tpu.memory_space<smem>>
    %110 = vector.broadcast %109 : f32 to vector<1x128xf32>
    %111 = arith.mulf %110, %98 : vector<1x128xf32>
    %112 = arith.addf %108, %111 : vector<1x128xf32>
    %cst_22 = arith.constant 5.000000e-01 : f32
    %113 = vector.broadcast %cst_22 : f32 to vector<1x128xf32>
    %114 = arith.mulf %113, %112 : vector<1x128xf32>
    %115 = math.tanh %114 : vector<1x128xf32>
    %cst_23 = arith.constant 5.000000e-01 : f32
    %116 = vector.broadcast %cst_23 : f32 to vector<1x128xf32>
    %117 = arith.mulf %116, %115 : vector<1x128xf32>
    %cst_24 = arith.constant 5.000000e-01 : f32
    %118 = vector.broadcast %cst_24 : f32 to vector<1x128xf32>
    %119 = arith.addf %117, %118 : vector<1x128xf32>
    %c28 = arith.constant 28 : index
    %120 = memref.load %arg3[%c28] : memref<31xf32, #tpu.memory_space<smem>>
    %c18 = arith.constant 18 : index
    %121 = memref.load %arg3[%c18] : memref<31xf32, #tpu.memory_space<smem>>
    %122 = vector.broadcast %121 : f32 to vector<1x128xf32>
    %123 = arith.mulf %122, %56 : vector<1x128xf32>
    %124 = vector.broadcast %120 : f32 to vector<1x128xf32>
    %125 = arith.addf %124, %123 : vector<1x128xf32>
    %c19 = arith.constant 19 : index
    %126 = memref.load %arg3[%c19] : memref<31xf32, #tpu.memory_space<smem>>
    %127 = vector.broadcast %126 : f32 to vector<1x128xf32>
    %128 = arith.mulf %127, %77 : vector<1x128xf32>
    %129 = arith.addf %125, %128 : vector<1x128xf32>
    %c20 = arith.constant 20 : index
    %130 = memref.load %arg3[%c20] : memref<31xf32, #tpu.memory_space<smem>>
    %131 = vector.broadcast %130 : f32 to vector<1x128xf32>
    %132 = arith.mulf %131, %98 : vector<1x128xf32>
    %133 = arith.addf %129, %132 : vector<1x128xf32>
    %cst_25 = arith.constant 5.000000e-01 : f32
    %134 = vector.broadcast %cst_25 : f32 to vector<1x128xf32>
    %135 = arith.mulf %134, %133 : vector<1x128xf32>
    %136 = math.tanh %135 : vector<1x128xf32>
    %cst_26 = arith.constant 5.000000e-01 : f32
    %137 = vector.broadcast %cst_26 : f32 to vector<1x128xf32>
    %138 = arith.mulf %137, %136 : vector<1x128xf32>
    %cst_27 = arith.constant 5.000000e-01 : f32
    %139 = vector.broadcast %cst_27 : f32 to vector<1x128xf32>
    %140 = arith.addf %138, %139 : vector<1x128xf32>
    %c29 = arith.constant 29 : index
    %141 = memref.load %arg3[%c29] : memref<31xf32, #tpu.memory_space<smem>>
    %c21 = arith.constant 21 : index
    %142 = memref.load %arg3[%c21] : memref<31xf32, #tpu.memory_space<smem>>
    %143 = vector.broadcast %142 : f32 to vector<1x128xf32>
    %144 = arith.mulf %143, %56 : vector<1x128xf32>
    %145 = vector.broadcast %141 : f32 to vector<1x128xf32>
    %146 = arith.addf %145, %144 : vector<1x128xf32>
    %c22 = arith.constant 22 : index
    %147 = memref.load %arg3[%c22] : memref<31xf32, #tpu.memory_space<smem>>
    %148 = vector.broadcast %147 : f32 to vector<1x128xf32>
    %149 = arith.mulf %148, %77 : vector<1x128xf32>
    %150 = arith.addf %146, %149 : vector<1x128xf32>
    %c23 = arith.constant 23 : index
    %151 = memref.load %arg3[%c23] : memref<31xf32, #tpu.memory_space<smem>>
    %152 = vector.broadcast %151 : f32 to vector<1x128xf32>
    %153 = arith.mulf %152, %98 : vector<1x128xf32>
    %154 = arith.addf %150, %153 : vector<1x128xf32>
    %cst_28 = arith.constant 5.000000e-01 : f32
    %155 = vector.broadcast %cst_28 : f32 to vector<1x128xf32>
    %156 = arith.mulf %155, %154 : vector<1x128xf32>
    %157 = math.tanh %156 : vector<1x128xf32>
    %cst_29 = arith.constant 5.000000e-01 : f32
    %158 = vector.broadcast %cst_29 : f32 to vector<1x128xf32>
    %159 = arith.mulf %158, %157 : vector<1x128xf32>
    %cst_30 = arith.constant 5.000000e-01 : f32
    %160 = vector.broadcast %cst_30 : f32 to vector<1x128xf32>
    %161 = arith.addf %159, %160 : vector<1x128xf32>
    %c30 = arith.constant 30 : index
    %162 = memref.load %arg3[%c30] : memref<31xf32, #tpu.memory_space<smem>>
    %c24 = arith.constant 24 : index
    %163 = memref.load %arg3[%c24] : memref<31xf32, #tpu.memory_space<smem>>
    %164 = vector.broadcast %163 : f32 to vector<1x128xf32>
    %165 = arith.mulf %164, %56 : vector<1x128xf32>
    %166 = vector.broadcast %162 : f32 to vector<1x128xf32>
    %167 = arith.addf %166, %165 : vector<1x128xf32>
    %c25 = arith.constant 25 : index
    %168 = memref.load %arg3[%c25] : memref<31xf32, #tpu.memory_space<smem>>
    %169 = vector.broadcast %168 : f32 to vector<1x128xf32>
    %170 = arith.mulf %169, %77 : vector<1x128xf32>
    %171 = arith.addf %167, %170 : vector<1x128xf32>
    %c26 = arith.constant 26 : index
    %172 = memref.load %arg3[%c26] : memref<31xf32, #tpu.memory_space<smem>>
    %173 = vector.broadcast %172 : f32 to vector<1x128xf32>
    %174 = arith.mulf %173, %98 : vector<1x128xf32>
    %175 = arith.addf %171, %174 : vector<1x128xf32>
    %cst_31 = arith.constant 5.000000e-01 : f32
    %176 = vector.broadcast %cst_31 : f32 to vector<1x128xf32>
    %177 = arith.mulf %176, %175 : vector<1x128xf32>
    %178 = math.tanh %177 : vector<1x128xf32>
    %cst_32 = arith.constant 5.000000e-01 : f32
    %179 = vector.broadcast %cst_32 : f32 to vector<1x128xf32>
    %180 = arith.mulf %179, %178 : vector<1x128xf32>
    %cst_33 = arith.constant 5.000000e-01 : f32
    %181 = vector.broadcast %cst_33 : f32 to vector<1x128xf32>
    %182 = arith.addf %180, %181 : vector<1x128xf32>
    %183 = tpu.concatenate %119, %140, %161, %182 in 0 : vector<1x128xf32>, vector<1x128xf32>, vector<1x128xf32>, vector<1x128xf32> -> vector<4x128xf32>
    %c0_34 = arith.constant 0 : index
    %c0_35 = arith.constant 0 : index
    %184 = vector.load %arg4[%c0_34, %c0_35] : memref<4x128xf32, #tpu.memory_space<vmem>>, vector<4x128xf32>
    tpu.vector_store %arg4[%c0_34, %c0_35], %183 {strides = array<i32>} : memref<4x128xf32, #tpu.memory_space<vmem>>, vector<4x128xf32>,
    return
  }
  func.func @transform_0(%arg0: i32) -> (i32, i32) {
    %c0_i32 = arith.constant 0 : i32
    %c0_i32_0 = arith.constant 0 : i32
    return %c0_i32, %arg0 : i32, i32
  }
  func.func @transform_1(%arg0: i32) -> (i32, i32) {
    %c0_i32 = arith.constant 0 : i32
    %c0_i32_0 = arith.constant 0 : i32
    %c0_i32_1 = arith.constant 0 : i32
    return %c0_i32, %c0_i32_0 : i32, i32
  }
  func.func @transform_2(%arg0: i32) -> i32 {
    %c0_i32 = arith.constant 0 : i32
    %c0_i32_0 = arith.constant 0 : i32
    return %c0_i32 : i32
  }
  func.func @transform_3(%arg0: i32) -> (i32, i32) {
    %c0_i32 = arith.constant 0 : i32
    %c0_i32_0 = arith.constant 0 : i32
    return %c0_i32, %arg0 : i32, i32
  }
}

</mosaic_0001>

<bundles_post_ra>
// kernel: tpu_custom_call.1
= control target key start
LH: loop header
LB: loop body
LE: loop exit
PB: predicated region body
PF: predicated region fallthrough
CT: control target
= control target key end

     0   :  { %8 = vsyncpa [#allocation3], 0  ;;  %s628_s0 = inlined_call_operand.hbm [shape: f32[16,128], index: 0, kind: input, shape index: {}]   ;;  %s629_s1 = inlined_call_operand.hbm [shape: f32[3,16], index: 1, kind: input, shape index: {}]   ;;  %s630_s2 = inlined_call_operand.vmem [shape: f32[31], index: 2, kind: input, shape index: {}]   ;;  %s631_s3 = inlined_call_operand.hbm [shape: f32[4,128], index: 3, kind: output, shape index: {}]  }
   0x1   :  { %9 = vsyncpa [#allocation7], 0 }
   0x2   :  { %10 = vsyncpa [#allocation5], 0 }
   0x3   :  { %11 = vsyncpa [#allocation4], 0  ;;  %s488_s12 = smov [#allocation2]   ;;  %s402_s16 = scalar_lea.hbm %s628_s0, 256 }
   0x4   :  { %s17_s13 = sshll.u32 %s488_s12, 4  ;;  %p403_p0 = scmp.ne.s32.totalorder %s628_s0, %s402_s16  ;;  %s18_s13 = int_to_ptr.vmem [resolvable:$true] %s17_s13 }
   0x5   :  { %p406_p1 = scmp.lt.u32.totalorder %s402_s16, %s628_s0 }
   0x7   :  { %p408_p2 = pnand %p406_p1, %p403_p0 }
   0x9   :  { %411 = shalt.err (!%p408_p2)
}
   0xa   :  { %s412_s21 = scalar_lea.vmem %s18_s13, 256  ;;  %p417_p4 = scmp.lt.s32.totalorder %s18_s13, %s18_s13 }
   0xb   :  { %p413_p3 = scmp.ne.s32.totalorder %s18_s13, %s412_s21  ;;  %p418_p5 = scmp.lt.s32.totalorder %s412_s21, %s412_s21 }
   0xd   :  { %p419_p6 = por %p418_p5, %p417_p4 }
   0xf   :  { %p420_p7 = pnand %p419_p6, %p413_p3 }
  0x11   :  { %423 = shalt.err (!%p420_p7)
}
  0x12   :  { %s489_s22 = smov 128   ;;  %s490_s23 = smov 8  }
  0x13   :  { %23 = dma.hbm_to_vmem [thread:$0]  %s628_s0, 256, %s18_s13, [#allocation3], %s489_s22, %s489_s22, %s490_s23  }
  0x14   :  { %s491_s26 = smov [#allocation6]   ;;  %s40_s30 = sshll.u32 %s630_s2, 4  ;;  %s41_s30 = int_to_ptr.vmem [resolvable:$true] %s40_s30 }
  0x15   :  { %s30_s27 = sshll.u32 %s491_s26, 4  ;;  %s424_s6 = scalar_lea.hbm %s629_s1, 64  ;;  %s31_s27 = int_to_ptr.vmem [resolvable:$true] %s30_s27 }
  0x16   :  { %p425_p8 = scmp.ne.s32.totalorder %s629_s1, %s424_s6  ;;  %p428_p9 = scmp.lt.u32.totalorder %s424_s6, %s629_s1 }
  0x18   :  { %p430_p10 = pnand %p428_p9, %p425_p8 }
  0x1a   :  { %433 = shalt.err (!%p430_p10)
}
  0x1b   :  { %s434_s0 = scalar_lea.vmem %s31_s27, 64  ;;  %p439_p12 = scmp.lt.s32.totalorder %s31_s27, %s31_s27 }
  0x1c   :  { %p435_p11 = scmp.ne.s32.totalorder %s31_s27, %s434_s0  ;;  %p440_p13 = scmp.lt.s32.totalorder %s434_s0, %s434_s0 }
  0x1e   :  { %p441_p0 = por %p440_p13, %p439_p12 }
  0x20   :  { %p442_p1 = pnand %p441_p0, %p435_p11 }
  0x22   :  { %445 = shalt.err (!%p442_p1)
}
  0x23   :  { %33 = dma.hbm_to_vmem [thread:$0]  %s629_s1, 64, %s31_s27, [#allocation7]  }
  0x24   :  { %s446_s12 = scalar_lea.vmem %s41_s30, 16  ;;  %p451_p3 = scmp.lt.s32.totalorder %s41_s30, %s41_s30 }
  0x25   :  { %p447_p2 = scmp.ne.s32.totalorder %s41_s30, %s446_s12  ;;  %p452_p4 = scmp.lt.s32.totalorder %s446_s12, %s446_s12 }
  0x27   :  { %p453_p5 = por %p452_p4, %p451_p3 }
  0x29   :  { %p454_p6 = pnand %p453_p5, %p447_p2 }
  0x2b   :  { %457 = shalt.err (!%p454_p6)
}
  0x2c   :  { %s492_s13 = smov [#allocation8]  }
  0x2d   :  { %43 = dma.vmem_to_smem %s41_s30, 16, %s492_s13, [#allocation5]  }
  0x2e   :  { %480 = dma.done.wait [#allocation3], 256  }
  0x2f   :  { %481 = vsyncadd [#allocation3], 4294967040 }
  0x30   :  { %482 = dma.done.wait [#allocation7], 64  }
  0x31   :  { %483 = vsyncadd [#allocation7], 4294967232 }
  0x32   :  { %484 = dma.done.wait [#allocation5], 16  }
  0x33   :  { %485 = vsyncadd [#allocation5], 4294967280 }
  0x34   :  { %53 = sfence }
  0x35   :  { %v54_v0 = vld [vmem:[#allocation2] sm:$0xff]  ;;  %v55_v1 = vld [vmem:[#allocation2 + $0x8] sm:$0xff]  ;;  %v493_v2 = vmov 0.0|0.0   ;;  %vm494_vm0 = vmmov 0   ;;  %v495_v4 = vmov 0.0   ;;  %vm57_vm1 = vcmask 130048  }
  0x36   :  { %370 = vmatprep.subr.bf16.mxu0 %v493_v2  ;;  %v371_v3 = vpack.c.bf16 %v55_v1, %v54_v0  ;;  %367 = vmatprep.mubr.msk.f32.mxu0 %vm494_vm0, %v495_v4  ;;  %v56_v5 = vld [vmem:[#allocation6] sm:$0x7]  ;;  %s131_s1 = sld [smem:[#allocation8]]  ;;  %s330_s14 = sld [smem:[#allocation8 + $0x1]]  ;;  %vm305_vm2 = vcmask 1040384   ;;  %vm307_vm3 = vcmask 1041408  }
  0x37   :  { %s331_s15 = sld [smem:[#allocation8 + $0x2]]  ;;  %s544_s16 = sld [smem:[#allocation8 + $0x3]]  ;;  %vm309_vm4 = vcmask 1042432  }
  0x38   :  { %372 = vmatpush3.bf16.msra.mxu0 %v371_v3  ;;  %s546_s17 = sld [smem:[#allocation8 + $0x4]]  ;;  %s548_s18 = sld [smem:[#allocation8 + $0x5]] }
  0x39   :  { %s550_s19 = sld [smem:[#allocation8 + $0xc]]  ;;  %s337_s20 = sld [smem:[#allocation8 + $0x6]] }
  0x3a   :  { %s552_s21 = sld [smem:[#allocation8 + $0xd]]  ;;  %s341_s22 = sld [smem:[#allocation8 + $0x9]] }
  0x3b   :  { %368 = vmatmul.mubr.msk.f32.vlgmr.msra.gmra.mrb[0].mxu0 %vm57_vm1, %v56_v5  ;;  %s338_s23 = sld [smem:[#allocation8 + $0x7]]  ;;  %s342_s24 = sld [smem:[#allocation8 + $0xa]] }
  0x3c   :  { %v132_v6 = vstv %s131_s1  ;;  %v139_v7 = vstv %s330_s14  ;;  %s554_s25 = sld [smem:[#allocation8 + $0x8]]  ;;  %s556_s26 = sld [smem:[#allocation8 + $0xe]] }
  0x3d   :  { %v146_v8 = vstv %s331_s15  ;;  %s558_s27 = sld [smem:[#allocation8 + $0xb]]  ;;  %v154_v20 = vstv %s544_s16  ;;  %s568_s28 = sld [smem:[#allocation8 + $0xf]] }
  0x3e   :  { %v159_v21 = vstv %s546_s17  ;;  %v166_v22 = vstv %s548_s18  ;;  %s570_s29 = sld [smem:[#allocation8 + $0x10]]  ;;  %s572_s30 = sld [smem:[#allocation8 + $0x11]] }
  0x3f   :  { %v156_v25 = vstv %s550_s19  ;;  %v178_v26 = vstv %s337_s20  ;;  %s574_s4 = sld [smem:[#allocation8 + $0x1b]]  ;;  %s576_s5 = sld [smem:[#allocation8 + $0x12]] }
  0x40   :  { %v202_v27 = vstv %s341_s22  ;;  %v180_v33 = vstv %s552_s21  ;;  %s578_s6 = sld [smem:[#allocation8 + $0x1c]]  ;;  %s580_s7 = sld [smem:[#allocation8 + $0x13]] }
  0x41   :  { %v183_v30 = vstv %s338_s23  ;;  %v207_v31 = vstv %s342_s24  ;;  %s582_s8 = sld [smem:[#allocation8 + $0x1d]]  ;;  %s586_s10 = sld [smem:[#allocation8 + $0x16]] }
  0x42   :  { %v190_v34 = vstv %s554_s25  ;;  %v204_v35 = vstv %s556_s26  ;;  %s584_s9 = sld [smem:[#allocation8 + $0x15]]  ;;  %s588_s0 = sld [smem:[#allocation8 + $0x18]] }
  0x43   :  { %v214_v43 = vstv %s558_s27  ;;  %s590_s2 = sld [smem:[#allocation8 + $0x1e]]  ;;  %s592_s11 = sld [smem:[#allocation8 + $0x19]]  ;;  %v226_v2 = vstv %s568_s28 }
  0x44   :  { %s594_s12 = sld [smem:[#allocation8 + $0x14]]  ;;  %s596_s13 = sld [smem:[#allocation8 + $0x17]]  ;;  %v231_v3 = vstv %s570_s29 }
  0x45   :  { %s598_s1 = sld [smem:[#allocation8 + $0x1a]]  ;;  %s496_s14 = smov [#allocation9]  }
  0x46   :  { %s318_s15 = sshll.u32 %s496_s14, 4  ;;  %s319_s15 = int_to_ptr.vmem [resolvable:$true] %s318_s15 }
  0x47   :  { %s458_s16 = scalar_lea.vmem %s319_s15, 64  ;;  %p463_p8 = scmp.lt.s32.totalorder %s319_s15, %s319_s15 }
  0x48   :  { %p459_p7 = scmp.ne.s32.totalorder %s319_s15, %s458_s16  ;;  %p464_p9 = scmp.lt.s32.totalorder %s458_s16, %s458_s16 }
  0x4a   :  { %p465_p10 = por %p464_p9, %p463_p8 }
  0x4c   :  { %p466_p11 = pnand %p465_p10, %p459_p7 }
 0x10e   :  { %v127_v9 = vpop.f32.mrb[0].mxu0 }
 0x10f   :  { %v133_v10 = vadd.f32 %v132_v6, %v127_v9  ;;  %v140_v11 = vadd.f32 %v139_v7, %v127_v9  ;;  %v147_v12 = vadd.f32 %v146_v8, %v127_v9  ;;  %v369_v13 = vpop.f32.mrb[1].mxu0  ;;  %v228_v6 = vstv %s574_s4 }
 0x110   :  { %v235_v7 = vstv %s572_s30  ;;  %v244_v8 = vstv %s576_s5  ;;  %v262_v13 = vstv %s584_s9 }
 0x111   :  { %v134_v14 = vmul.f32 0.5, %v133_v10  ;;  %v141_v15 = vmul.f32 0.5, %v140_v11  ;;  %v148_v16 = vmul.f32 0.5, %v147_v12  ;;  %v246_v11 = vstv %s578_s6 }
 0x112   :  { %v249_v12 = vstv %s580_s7 }
 0x113   :  { %382 = vtanh.f32 %v134_v14 }
 0x114   :  { %384 = vtanh.f32 %v141_v15 }
 0x115   :  { %386 = vtanh.f32 %v148_v16  ;;  %v264_v16 = vstv %s582_s8 }
 0x11d   :  { %v383_v17 = vpop.eup %382 }
 0x11e   :  { %v385_v18 = vpop.eup %384  ;;  %v136_v19 = vmul.f32 0.5, %v383_v17  ;;  %v280_v17 = vstv %s588_s0 }
 0x11f   :  { %v387_v23 = vpop.eup %386  ;;  %v143_v24 = vmul.f32 0.5, %v385_v18 }
 0x120   :  { %v137_v28 = vadd.f32 0.5, %v136_v19  ;;  %v150_v29 = vmul.f32 0.5, %v387_v23  ;;  %v267_v19 = vstv %s586_s10 }
 0x121   :  { %v144_v32 = vadd.f32 0.5, %v143_v24 }
 0x122   :  { %v151_v36 = vadd.f32 0.5, %v150_v29  ;;  %v155_v37 = vmul.f32 %v154_v20, %v137_v28  ;;  %v179_v38 = vmul.f32 %v178_v26, %v137_v28  ;;  %v203_v39 = vmul.f32 %v202_v27, %v137_v28 }
 0x123   :  { %v160_v40 = vmul.f32 %v159_v21, %v144_v32  ;;  %v184_v41 = vmul.f32 %v183_v30, %v144_v32  ;;  %v208_v42 = vmul.f32 %v207_v31, %v144_v32  ;;  %v282_v20 = vstv %s590_s2 }
 0x124   :  { %v157_v44 = vadd.f32 %v156_v25, %v155_v37  ;;  %v167_v45 = vmul.f32 %v166_v22, %v151_v36  ;;  %v181_v46 = vadd.f32 %v180_v33, %v179_v38  ;;  %v191_v47 = vmul.f32 %v190_v34, %v151_v36 }
 0x125   :  { %v162_v48 = vrot.slane %v160_v40, 1  ;;  %v186_v49 = vrot.slane %v184_v41, 1  ;;  %v205_v50 = vadd.f32 %v204_v35, %v203_v39  ;;  %v210_v51 = vrot.slane %v208_v42, 1 }
 0x126   :  { %v169_v52 = vrot.slane %v167_v45, 2  ;;  %v215_v53 = vmul.f32 %v214_v43, %v151_v36  ;;  %v193_v56 = vrot.slane %v191_v47, 2  ;;  %v285_v21 = vstv %s592_s11 }
 0x127   :  { %v164_v54 = vadd.f32 %v162_v48, %v157_v44  ;;  %v188_v55 = vadd.f32 %v186_v49, %v181_v46  ;;  %v212_v57 = vadd.f32 %v210_v51, %v205_v50  ;;  %v253_v26 = vstv %s594_s12 }
 0x128   :  { %v217_v58 = vrot.slane %v215_v53, 2  ;;  %v271_v27 = vstv %s596_s13  ;;  %v289_v29 = vstv %s598_s1 }
 0x129   :  { %v171_v59 = vadd.f32 %v169_v52, %v164_v54  ;;  %v195_v60 = vadd.f32 %v193_v56, %v188_v55 }
 0x12a   :  { %v219_v61 = vadd.f32 %v217_v58, %v212_v57 }
 0x12b   :  { %v172_v62 = vmul.f32 0.5, %v171_v59  ;;  %v196_v63 = vmul.f32 0.5, %v195_v60 }
 0x12c   :  { %v220_v0 = vmul.f32 0.5, %v219_v61 }
 0x12d   :  { %388 = vtanh.f32 %v172_v62 }
 0x12e   :  { %390 = vtanh.f32 %v196_v63 }
 0x12f   :  { %392 = vtanh.f32 %v220_v0 }
 0x137   :  { %v389_v1 = vpop.eup %388 }
 0x138   :  { %v391_v4 = vpop.eup %390  ;;  %v174_v5 = vmul.f32 0.5, %v389_v1 }
 0x139   :  { %v393_v9 = vpop.eup %392  ;;  %v198_v10 = vmul.f32 0.5, %v391_v4 }
 0x13a   :  { %v175_v14 = vadd.f32 0.5, %v174_v5  ;;  %v222_v15 = vmul.f32 0.5, %v393_v9 }
 0x13b   :  { %v199_v18 = vadd.f32 0.5, %v198_v10 }
 0x13c   :  { %v223_v22 = vadd.f32 0.5, %v222_v15  ;;  %v227_v23 = vmul.f32 %v226_v2, %v175_v14  ;;  %v245_v24 = vmul.f32 %v244_v8, %v175_v14  ;;  %v263_v25 = vmul.f32 %v262_v13, %v175_v14 }
 0x13d   :  { %v281_v28 = vmul.f32 %v280_v17, %v175_v14  ;;  %v232_v31 = vmul.f32 %v231_v3, %v199_v18  ;;  %v250_v33 = vmul.f32 %v249_v12, %v199_v18  ;;  %v268_v35 = vmul.f32 %v267_v19, %v199_v18 }
 0x13e   :  { %v229_v30 = vadd.f32 %v228_v6, %v227_v23  ;;  %v247_v32 = vadd.f32 %v246_v11, %v245_v24  ;;  %v265_v34 = vadd.f32 %v264_v16, %v263_v25  ;;  %v286_v37 = vmul.f32 %v285_v21, %v199_v18 }
 0x13f   :  { %v283_v36 = vadd.f32 %v282_v20, %v281_v28  ;;  %v236_v39 = vmul.f32 %v235_v7, %v223_v22  ;;  %v254_v41 = vmul.f32 %v253_v26, %v223_v22  ;;  %v272_v43 = vmul.f32 %v271_v27, %v223_v22 }
 0x140   :  { %v233_v38 = vadd.f32 %v232_v31, %v229_v30  ;;  %v251_v40 = vadd.f32 %v250_v33, %v247_v32  ;;  %v269_v42 = vadd.f32 %v268_v35, %v265_v34  ;;  %v290_v45 = vmul.f32 %v289_v29, %v223_v22 }
 0x141   :  { %v287_v44 = vadd.f32 %v286_v37, %v283_v36 }
 0x142   :  { %v237_v46 = vadd.f32 %v236_v39, %v233_v38  ;;  %v255_v47 = vadd.f32 %v254_v41, %v251_v40  ;;  %v273_v48 = vadd.f32 %v272_v43, %v269_v42 }
 0x143   :  { %v291_v49 = vadd.f32 %v290_v45, %v287_v44 }
 0x144   :  { %v238_v50 = vmul.f32 0.5, %v237_v46  ;;  %v256_v51 = vmul.f32 0.5, %v255_v47  ;;  %v274_v52 = vmul.f32 0.5, %v273_v48 }
 0x145   :  { %v292_v53 = vmul.f32 0.5, %v291_v49 }
 0x146   :  { %394 = vtanh.f32 %v238_v50 }
 0x147   :  { %396 = vtanh.f32 %v256_v51 }
 0x148   :  { %398 = vtanh.f32 %v274_v52 }
 0x149   :  { %400 = vtanh.f32 %v292_v53 }
 0x150   :  { %v395_v54 = vpop.eup %394 }
 0x151   :  { %v397_v55 = vpop.eup %396  ;;  %v240_v57 = vmul.f32 0.5, %v395_v54 }
 0x152   :  { %v399_v56 = vpop.eup %398  ;;  %v258_v58 = vmul.f32 0.5, %v397_v55 }
 0x153   :  { %v401_v59 = vpop.eup %400  ;;  %v276_v60 = vmul.f32 0.5, %v399_v56  ;;  %v241_v0 = vadd.f32 0.5, %v240_v57 }
 0x154   :  { %v259_v61 = vadd.f32 0.5, %v258_v58  ;;  %v294_v62 = vmul.f32 0.5, %v401_v59 }
 0x155   :  { %v277_v63 = vadd.f32 0.5, %v276_v60 }
 0x156   :  { %v295_v1 = vadd.f32 0.5, %v294_v62  ;;  %v297_v2 = vrot.slane %v259_v61, 7 }
 0x157   :  { %v300_v3 = vrot.slane %v277_v63, 6 }
 0x158   :  { %v303_v4 = vrot.slane %v295_v1, 5  ;;  %v306_v5 = vsel %vm305_vm2, %v241_v0, %v297_v2 }
 0x159   :  { %v308_v6 = vsel %vm307_vm3, %v306_v5, %v300_v3 }
 0x15a   :  { %v310_v7 = vsel %vm309_vm4, %v308_v6, %v303_v4 }
 0x15b   :  { %311 = vst [vmem:[#allocation9] sm:$0xf] %v310_v7 }
 0x15c   :  { %469 = shalt.err (!%p466_p11)
}
 0x15d   :  { %s470_s19 = scalar_lea.hbm %s631_s3, 64 }
 0x15e   :  { %p471_p12 = scmp.ne.s32.totalorder %s631_s3, %s470_s19  ;;  %p474_p13 = scmp.lt.u32.totalorder %s470_s19, %s631_s3 }
 0x160   :  { %p476_p0 = pnand %p474_p13, %p471_p12 }
 0x162   :  { %479 = shalt.err (!%p476_p0)
}
 0x163   :  { %321 = dma.vmem_to_hbm [thread:$0]  %s319_s15, 64, %s631_s3, [#allocation4]  }
 0x164   :  { %486 = dma.done.wait [#allocation4], 64  }
 0x165   :  { %487 = vsyncadd [#allocation4], 4294967232 }
 0x166   :  { %325 = vsyncpa [#allocation3], 1 }
 0x167   :  { %326 = vsyncpa [#allocation7], 1 }
 0x168   :  { %327 = vsyncpa [#allocation4], 1 }
 0x169   :  { %328 = vsyncpa [#allocation5], 1 }

</bundles_post_ra>
